<compile_context>
chip_gen: v7x
topology: tpu7x:2x2x1
jax: 0.10.0
libtpu: 0.0.40
codegen_flags: <defaults>
</compile_context>

<pallas_src>
import functools

import jax
import jax.numpy as jnp
from jax.experimental import pallas as pl
from jax.experimental.pallas import tpu as pltpu


def _sdpa_kernel(*refs, inv_temperature, has_mask):
    if has_mask:
        mask_ref, q_ref, k_ref, v_ref, o_ref, a_ref = refs
    else:
        q_ref, k_ref, v_ref, o_ref, a_ref = refs
        mask_ref = None

    q = q_ref[...]                                  # (G, tq, Dk)
    k = k_ref[...]                                  # (G, Lk, Dk)
    v = v_ref[...]                                  # (G, Lk, Dv)

    # Batched NT contraction straight on the MXU (contract Dk of q with Dk of
    # k, batch over the head-group axis) — no explicit k transpose.
    s = jax.lax.dot_general(
        q, k,
        dimension_numbers=(((2,), (2,)), ((0,), (0,))),
        preferred_element_type=jnp.float32)         # (G, tq, Lk) f32
    # scalar temperature applied on the f32 scores ((q/T)·kᵀ == (q·kᵀ)/T)
    s = s * inv_temperature

    if has_mask:
        # mask_ref is (1, tq, Lk) or (G, tq, Lk); broadcasts against s.
        s = jnp.where(mask_ref[...] == 0, -1000000000.0, s)

    # numerically-stable softmax over the last axis (matches F.softmax(dim=-1))
    m = jnp.max(s, axis=-1, keepdims=True)
    e = jnp.exp(s - m)
    denom = jnp.sum(e, axis=-1, keepdims=True)
    attn = e * pl.reciprocal(denom, approx=True)    # EUP vrcp slot

    out = jax.lax.dot_general(
        attn.astype(v.dtype), v,
        dimension_numbers=(((2,), (1,)), ((0,), (0,))),
        preferred_element_type=jnp.float32)         # (G, tq, Dv)

    o_ref[...] = out.astype(o_ref.dtype)
    a_ref[...] = attn.astype(a_ref.dtype)


def _pick_divisor(n, target):
    """Largest divisor of n that is <= target."""
    t = max(1, min(n, target))
    while n % t != 0:
        t -= 1
    return t


def _pick_q_tile(lq, target=256):
    """q-tile: full Lq if small, else a divisor of Lq that is a multiple of 8."""
    if lq <= target:
        return lq
    t = (target // 8) * 8
    while t >= 8:
        if lq % t == 0:
            return t
        t -= 8
    return lq


def scaled_dot_product_attention(q, k, v, temperature, mask=None,
                                 *, bh_tile=None, q_tile=None):
    """Pallas TPU implementation of ScaledDotProductAttention.forward.

    q: (B, H, Lq, Dk), k: (B, H, Lk, Dk), v: (B, H, Lk, Dv)
    mask: optional, broadcastable to (B, H, Lq, Lk); positions where mask == 0
          are filled with -1e9 before the softmax (mask expected integer/bool).
    Returns (output, attn) with shapes (B, H, Lq, Dv), (B, H, Lq, Lk); attn is
    returned in the input dtype.
    """
    B, H, Lq, Dk = q.shape
    Lk = k.shape[2]
    Dv = v.shape[3]
    BH = B * H
    # Python float -> compile-time constant (fixes "captures constants" error).
    inv_temperature = 1.0 / float(temperature)

    if bh_tile is None:
        bh_tile = _pick_divisor(H, 8)     # heads per grid step (divides H)
    assert H % bh_tile == 0, "bh_tile must divide H"
    if q_tile is None:
        q_tile = _pick_q_tile(Lq)
    assert Lq % q_tile == 0, "q_tile must divide Lq"

    # Collapse (B, H) -> BH; free, contiguous reshape.
    q3 = q.reshape(BH, Lq, Dk)
    k3 = k.reshape(BH, Lk, Dk)
    v3 = v.reshape(BH, Lk, Dv)

    grid = (BH // bh_tile, Lq // q_tile)

    q_spec = pl.BlockSpec((bh_tile, q_tile, Dk), lambda g, i: (g, i, 0))
    k_spec = pl.BlockSpec((bh_tile, Lk, Dk), lambda g, i: (g, 0, 0))
    v_spec = pl.BlockSpec((bh_tile, Lk, Dv), lambda g, i: (g, 0, 0))
    o_spec = pl.BlockSpec((bh_tile, q_tile, Dv), lambda g, i: (g, i, 0))
    a_spec = pl.BlockSpec((bh_tile, q_tile, Lk), lambda g, i: (g, i, 0))

    out_shape = (
        jax.ShapeDtypeStruct((BH, Lq, Dv), q.dtype),
        jax.ShapeDtypeStruct((BH, Lq, Lk), q.dtype),
    )

    in_specs = [q_spec, k_spec, v_spec]
    args = [q3, k3, v3]
    has_mask = mask is not None

    if has_mask:
        m = jnp.asarray(mask)
        while m.ndim < 4:
            m = m[None]
        if m.shape[1] == 1:
            # Shared across heads: keep ONE int8 copy per batch in HBM and
            # re-use it for every head group via the index_map (no H×
            # replication, no int32 upcast).
            m3 = jnp.broadcast_to(m, (B, 1, Lq, Lk))[:, 0].astype(jnp.int8)
            m_spec = pl.BlockSpec(
                (1, q_tile, Lk),
                lambda g, i: ((g * bh_tile) // H, i, 0))
        else:
            # Per-head mask: materialize at (BH, Lq, Lk) in int8.
            m3 = jnp.broadcast_to(m, (B, H, Lq, Lk)).reshape(
                BH, Lq, Lk).astype(jnp.int8)
            m_spec = pl.BlockSpec((bh_tile, q_tile, Lk), lambda g, i: (g, i, 0))
        in_specs = [m_spec] + in_specs
        args = [m3] + args

    kernel = functools.partial(_sdpa_kernel,
                               inv_temperature=inv_temperature,
                               has_mask=has_mask)

    out3, attn3 = pl.pallas_call(
        kernel,
        out_shape=out_shape,
        grid_spec=pltpu.PrefetchScalarGridSpec(
            num_scalar_prefetch=0,
            grid=grid,
            in_specs=in_specs,
            out_specs=[o_spec, a_spec],
        ),
        compiler_params=pltpu.CompilerParams(
            dimension_semantics=("parallel", "parallel")),
    )(*args)

    return out3.reshape(B, H, Lq, Dv), attn3.reshape(B, H, Lq, Lk)


def _reference(q, k, v, temperature, mask=None):
    attn = jnp.einsum("bhqd,bhkd->bhqk", q / temperature, k)
    if mask is not None:
        attn = jnp.where(mask == 0, -1000000000.0, attn)
    attn = jax.nn.softmax(attn, axis=-1)
    out = jnp.einsum("bhqk,bhkd->bhqd", attn, v)
    return out, attn


if __name__ == "__main__":
    B, H, Lq, Lk, Dk, Dv = 2, 4, 8, 8, 32, 32
    temperature = float(Dk) ** 0.5

    key = jax.random.PRNGKey(0)
    kq, kk, kv, km = jax.random.split(key, 4)
    q = jax.random.normal(kq, (B, H, Lq, Dk), dtype=jnp.float32)
    k = jax.random.normal(kk, (B, H, Lk, Dk), dtype=jnp.float32)
    v = jax.random.normal(kv, (B, H, Lk, Dv), dtype=jnp.float32)
    # a broadcastable mask like PyTorch usage: (B, 1, Lq, Lk), 0 = masked out
    mask = (jax.random.uniform(km, (B, 1, Lq, Lk)) > 0.2).astype(jnp.int32)

    # Tolerances relaxed slightly: the softmax denominator uses the EUP
    # approximate reciprocal (pl.reciprocal(approx=True)).
    ATOL = RTOL = 2e-2

    # no-mask path
    out_nm, attn_nm = scaled_dot_product_attention(q, k, v, temperature)
    jax.block_until_ready((out_nm, attn_nm))
    ref_out_nm, ref_attn_nm = _reference(q, k, v, temperature)
    assert out_nm.shape == ref_out_nm.shape and attn_nm.shape == ref_attn_nm.shape
    assert jnp.allclose(out_nm, ref_out_nm, atol=ATOL, rtol=RTOL)
    assert jnp.allclose(attn_nm, ref_attn_nm, atol=ATOL, rtol=RTOL)

    # masked path
    out_m, attn_m = scaled_dot_product_attention(q, k, v, temperature, mask)
    jax.block_until_ready((out_m, attn_m))
    ref_out_m, ref_attn_m = _reference(q, k, v, temperature, mask)
    assert jnp.allclose(out_m, ref_out_m, atol=ATOL, rtol=RTOL)
    assert jnp.allclose(attn_m, ref_attn_m, atol=ATOL, rtol=RTOL)

    print("KERNEL_OK")
</pallas_src>

<mosaic_0001>
module attributes {stable_mosaic.version = 11 : i64} {
  func.func @_sdpa_kernel(%arg0: i32, %arg1: i32, %arg2: memref<4x8x32xf32, #tpu.memory_space<vmem>>, %arg3: memref<4x8x32xf32, #tpu.memory_space<vmem>>, %arg4: memref<4x8x32xf32, #tpu.memory_space<vmem>>, %arg5: memref<4x8x32xf32, #tpu.memory_space<vmem>>, %arg6: memref<4x8x8xf32, #tpu.memory_space<vmem>>) attributes {dimension_semantics = [#tpu.dimension_semantics<parallel>, #tpu.dimension_semantics<parallel>], iteration_bounds = array<i64: 2, 1>, scalar_prefetch = 0 : i64, scratch_operands = 0 : i64, tpu.core_type = #tpu.core_type<tc>, window_params = [{transform_indices = @transform_0, window_bounds = array<i64: 4, 8, 32>}, {transform_indices = @transform_1, window_bounds = array<i64: 4, 8, 32>}, {transform_indices = @transform_2, window_bounds = array<i64: 4, 8, 32>}, {transform_indices = @transform_3, window_bounds = array<i64: 4, 8, 32>}, {transform_indices = @transform_4, window_bounds = array<i64: 4, 8, 8>}]} {
    %c0 = arith.constant 0 : index
    %c0_0 = arith.constant 0 : index
    %c0_1 = arith.constant 0 : index
    %0 = vector.load %arg2[%c0, %c0_0, %c0_1] : memref<4x8x32xf32, #tpu.memory_space<vmem>>, vector<4x8x32xf32>
    %c0_2 = arith.constant 0 : index
    %c0_3 = arith.constant 0 : index
    %c0_4 = arith.constant 0 : index
    %1 = vector.load %arg3[%c0_2, %c0_3, %c0_4] : memref<4x8x32xf32, #tpu.memory_space<vmem>>, vector<4x8x32xf32>
    %c0_5 = arith.constant 0 : index
    %c0_6 = arith.constant 0 : index
    %c0_7 = arith.constant 0 : index
    %2 = vector.load %arg4[%c0_5, %c0_6, %c0_7] : memref<4x8x32xf32, #tpu.memory_space<vmem>>, vector<4x8x32xf32>
    %cst = arith.constant dense<0.000000e+00> : vector<4x8x8xf32>
    %3 = tpu.matmul %0, %1, %cst {dimension_numbers = #tpu.dot_dimension_numbers<[2], [2], [1], [1], [0, 0, 0, 1, 1, 1], [0], [0]>} : vector<4x8x32xf32>, vector<4x8x32xf32>, vector<4x8x8xf32> -> vector<4x8x8xf32>
    %cst_8 = arith.constant 0.176776692 : f32
    %4 = vector.broadcast %cst_8 : f32 to vector<4x8x8xf32>
    %5 = arith.mulf %3, %4 : vector<4x8x8xf32>
    %cst_9 = arith.constant dense<0xFF800000> : vector<4x8xf32>
    %6 = vector.multi_reduction <maximumf>, %5, %cst_9 [2] : vector<4x8x8xf32> to vector<4x8xf32>
    %7 = vector.shape_cast %6 : vector<4x8xf32> to vector<4x8x1xf32>
    %8 = vector.broadcast %7 : vector<4x8x1xf32> to vector<4x8x8xf32>
    %9 = arith.subf %5, %8 : vector<4x8x8xf32>
    %10 = math.exp %9 : vector<4x8x8xf32>
    %cst_10 = arith.constant dense<0.000000e+00> : vector<4x8xf32>
    %11 = vector.multi_reduction <add>, %10, %cst_10 [2] : vector<4x8x8xf32> to vector<4x8xf32>
    %12 = vector.shape_cast %11 : vector<4x8xf32> to vector<4x8x1xf32>
    %13 = tpu.reciprocal %12 {approx = true} : vector<4x8x1xf32> -> vector<4x8x1xf32>
    %14 = vector.broadcast %13 : vector<4x8x1xf32> to vector<4x8x8xf32>
    %15 = arith.mulf %10, %14 : vector<4x8x8xf32>
    %cst_11 = arith.constant dense<0.000000e+00> : vector<4x8x32xf32>
    %16 = tpu.matmul %15, %2, %cst_11 {dimension_numbers = #tpu.dot_dimension_numbers<[2], [1], [1], [2], [0, 0, 0, 1, 1, 2], [0], [0]>} : vector<4x8x8xf32>, vector<4x8x32xf32>, vector<4x8x32xf32> -> vector<4x8x32xf32>
    %c0_12 = arith.constant 0 : index
    %c0_13 = arith.constant 0 : index
    %c0_14 = arith.constant 0 : index
    %17 = vector.load %arg5[%c0_12, %c0_13, %c0_14] : memref<4x8x32xf32, #tpu.memory_space<vmem>>, vector<4x8x32xf32>
    tpu.vector_store %arg5[%c0_12, %c0_13, %c0_14], %16 {strides = array<i32>} : memref<4x8x32xf32, #tpu.memory_space<vmem>>, vector<4x8x32xf32>,
    %c0_15 = arith.constant 0 : index
    %c0_16 = arith.constant 0 : index
    %c0_17 = arith.constant 0 : index
    %18 = vector.load %arg6[%c0_15, %c0_16, %c0_17] : memref<4x8x8xf32, #tpu.memory_space<vmem>>, vector<4x8x8xf32>
    tpu.vector_store %arg6[%c0_15, %c0_16, %c0_17], %15 {strides = array<i32>} : memref<4x8x8xf32, #tpu.memory_space<vmem>>, vector<4x8x8xf32>,
    return
  }
  func.func @transform_0(%arg0: i32, %arg1: i32) -> (i32, i32, i32) {
    %c0_i32 = arith.constant 0 : i32
    %c0_i32_0 = arith.constant 0 : i32
    return %arg0, %arg1, %c0_i32 : i32, i32, i32
  }
  func.func @transform_1(%arg0: i32, %arg1: i32) -> (i32, i32, i32) {
    %c0_i32 = arith.constant 0 : i32
    %c0_i32_0 = arith.constant 0 : i32
    %c0_i32_1 = arith.constant 0 : i32
    return %arg0, %c0_i32, %c0_i32_0 : i32, i32, i32
  }
  func.func @transform_2(%arg0: i32, %arg1: i32) -> (i32, i32, i32) {
    %c0_i32 = arith.constant 0 : i32
    %c0_i32_0 = arith.constant 0 : i32
    %c0_i32_1 = arith.constant 0 : i32
    return %arg0, %c0_i32, %c0_i32_0 : i32, i32, i32
  }
  func.func @transform_3(%arg0: i32, %arg1: i32) -> (i32, i32, i32) {
    %c0_i32 = arith.constant 0 : i32
    %c0_i32_0 = arith.constant 0 : i32
    return %arg0, %arg1, %c0_i32 : i32, i32, i32
  }
  func.func @transform_4(%arg0: i32, %arg1: i32) -> (i32, i32, i32) {
    %c0_i32 = arith.constant 0 : i32
    %c0_i32_0 = arith.constant 0 : i32
    return %arg0, %arg1, %c0_i32 : i32, i32, i32
  }
}

</mosaic_0001>

<bundles_post_ra>
// kernel: tpu_custom_call.1
= control target key start
LH: loop header
LB: loop body
LE: loop exit
PB: predicated region body
PF: predicated region fallthrough
CT: control target
= control target key end

     0   :  { %s2022_s0 = inlined_call_operand.hbm [shape: f32[8,8,32], index: 0, kind: input, shape index: {}]   ;;  %s2023_s1 = inlined_call_operand.hbm [shape: f32[8,8,32], index: 1, kind: input, shape index: {}]   ;;  %s2024_s2 = inlined_call_operand.hbm [shape: f32[8,8,32], index: 2, kind: input, shape index: {}]   ;;  %s2025_s3 = inlined_call_operand.hbm [shape: f32[8,8,32], index: 3, kind: output, shape index: {0}]   ;;  %s2026_s4 = inlined_call_operand.hbm [shape: f32[8,8,8], index: 4, kind: output, shape index: {1}]  }
   0x1   :  { %2038 = sst [smem:[#allocation19_spill]] %s2023_s1 }
   0x2   :  { %10 = vsyncpa [#allocation3], 0 }
   0x3   :  { %12 = vsyncpa [#allocation3 + $0x1], 0 }
   0x4   :  { %13 = vsyncpa [#allocation6], 0 }
   0x5   :  { %15 = vsyncpa [#allocation6 + $0x1], 0 }
   0x6   :  { %16 = vsyncpa [#allocation4], 0 }
   0x7   :  { %18 = vsyncpa [#allocation4 + $0x1], 0 }
   0x8   :  { %19 = vsyncpa [#allocation10], 0 }
   0x9   :  { %21 = vsyncpa [#allocation10 + $0x1], 0  ;;  %s1638_s15 = smov 0   ;;  %s1640_s16 = smov 0  }
   0xa   :  { %s1642_s17 = smov 0   ;;  %s1644_s18 = smov 0  }
   0xb   :  { %s1646_s19 = smov 0   ;;  %s1648_s20 = smov 0  }
   0xc LB: > { %2039 = sst [smem:[#allocation15_spill]] %s1596_s19  ;;  %s1669_s21 = sadd.s32 4294967295, %s1600_s20   ;;  %s1600_s20 = sphi %s1648_s20, %s27_s20   ;;  %s1596_s19 = sphi %s1646_s19, %s2064_s19   ;;  %s1592_s18 = sphi %s1644_s18, %s2063_s18   ;;  %s1588_s17 = sphi %s1642_s17, %s2067_s17   ;;  %s1584_s16 = sphi %s1640_s16, %s2066_s16   ;;  %s1580_s15 = sphi %s1638_s15, %s2065_s15  }
   0xd   : > { %2040 = sst [smem:[#allocation16_spill]] %s1600_s20  ;;  %s1194_s22 = sadd.s32 4294967294, %s1600_s20  }
   0xe   : > { %s39_s23 = sadd.s32 1, %s1596_s19  ;;  %s48_s24 = sadd.s32 1, %s1588_s17 }
   0xf   : > { %p41_p0 = scmp.ge.s32.totalorder %s39_s23, 2  ;;  %p55_p1 = scmp.ne.s32.totalorder %s1588_s17, %s1584_s16 }
  0x10   : > { %p56_p2 = scmp.eq.s32.totalorder %s1600_s20, 0  ;;  %p61_p3 = scmp.ne.s32.totalorder %s1584_s16, %s1580_s15 }
  0x11   : > { %s2069_s23 = smov (%p41_p0, %s39_s23), 0  ;;  %p62_p5 = scmp.eq.s32.totalorder %s1669_s21, 0 }
  0x12   : > { %2041 = sst [smem:[#allocation17_spill]] %s2069_s23  ;;  %p1681_p4 = por %p56_p2, %p55_p1 }
  0x13   : > { %s43_s26 = ssub.s32 %s1596_s19, %s2069_s23  ;;  %p139_p6 = scmp.eq.s32.totalorder %s1669_s21, 1 }
  0x14   : > { %p46_p7 = scmp.eq.s32.totalorder %s43_s26, 0  ;;  %p1689_p8 = por %p62_p5, %p61_p3 }
  0x15   : > { %p1693_p9 = por %p139_p6, %p55_p1  ;;  %p145_p10 = scmp.eq.s32.totalorder %s1194_s22, 1 }
  0x16   : > { %s2043_s27 = scalar_select %p1689_p8, 1, 0 }
  0x17   : > { %s2044_s28 = scalar_select %p1693_p9, 1, 0 }
  0x18   : > { %s1698_s29 = scalar_select %p46_p7, %s1588_s17, %s48_s24  }
  0x19   : > { %p1700_p11 = por %p145_p10, %p61_p3  ;;  %p1320_p13 = scmp.lt.s32.totalorder %s1600_s20, 2 }
  0x1a   : > { %2045 = sst [smem:[#allocation18_spill]] %s1698_s29  ;;  %s2027_s5 = sand.u32 1, %s1588_s17  }
  0x1b   : > { %s2046_s30 = scalar_select %p1700_p11, 1, 0 }
  0x1c   : > { %s1709_s6 = sshll.u32 %s2027_s5, 5  ;;  %s1712_s7 = sshll.u32 %s1596_s19, 9 }
  0x1d   : > { %p1716_p0 = pnand %p1320_p13, %p1681_p4  ;;  %s215_s9 = sand.u32 1, %s1600_s20  }
  0x1e   : > { %s2048_s1 = sld [smem:[#allocation19_spill]]  ;;  %s219_s13 = scalar_lea.vmem [#allocation5], %s1709_s6 }
  0x1f   : > { %s226_s14 = sshll.u32 %s219_s13, 4  ;;  %s1732_s22 = scalar_lea.sflag [#allocation6], %s215_s9  ;;  %s1729_s14 = int_to_ptr.vmem [resolvable:$true] %s226_s14 }
  0x20   : > { %p1738_p4 = pneg %p1716_p0 }
  0x24   : > { %s1725_s12 = scalar_lea.hbm %s2048_s1, %s1712_s7  ;;  %s1397_s11 = scalar_lea.hbm %s2048_s1, 1024 }
  0x25   : > { %s1392_s24 = scalar_lea.hbm %s1725_s12, 512  ;;  %p1398_p7 = scmp.lt.u32.totalorder %s1725_s12, %s2048_s1 }
  0x26   : > { %p1393_p3 = scmp.ne.s32.totalorder %s1725_s12, %s1392_s24  ;;  %p1399_p10 = scmp.lt.u32.totalorder %s1397_s11, %s1392_s24 }
  0x27   : > { %p1401_p12 = scmp.lt.u32.totalorder %s1392_s24, %s1725_s12 }
  0x28   : > { %p1395_p5 = pnand %p1738_p4, %p1393_p3  ;;  %p1400_p13 = por %p1399_p10, %p1398_p7 }
  0x2a   : > { %p1396_p6 = pneg %p1395_p5  ;;  %p1402_p1 = por %p1401_p12, %p1400_p13 }
  0x2c   : > { %p1403_p2 = pnand %p1402_p1, %p1396_p6 }
  0x2e   : > { %1406 = shalt.err (!%p1403_p2)
}
  0x2f   : > { %s1407_s9 = scalar_lea.vmem %s1729_s14, 512  ;;  %s1602_s26 = smov [#allocation5]  }
  0x30   : > { %p1408_p3 = scmp.ne.s32.totalorder %s1729_s14, %s1407_s9  ;;  %s1412_s10 = sshll.u32 %s1602_s26, 4  ;;  %s1413_s10 = int_to_ptr.vmem [resolvable:$false] %s1412_s10 }
  0x31   : > { %s1414_s5 = scalar_lea.vmem %s1413_s10, 1024  ;;  %p1415_p9 = scmp.lt.s32.totalorder %s1729_s14, %s1413_s10 }
  0x32   : > { %p1410_p5 = pnand %p1408_p3, %p1738_p4  ;;  %p1416_p8 = scmp.lt.s32.totalorder %s1414_s5, %s1407_s9 }
  0x34   : > { %p1411_p11 = pneg %p1410_p5  ;;  %p1417_p7 = por %p1416_p8, %p1415_p9 }
  0x36   : > { %p1418_p10 = pnand %p1417_p7, %p1411_p11 }
  0x38   : > { %1421 = shalt.err (!%p1418_p10)
}
  0x39   : > { %s2030_s24 = smov 128   ;;  %s2032_s11 = smov 8  }
  0x3a   : > { %1309 = dma.hbm_to_vmem [thread:$0]  (!%p1716_p0), %s1725_s12, 512, %s1729_s14, %s1732_s22, %s2030_s24, %s2030_s24, %s2032_s11  }
  0x3b   : > { %p2050_p8 = scmp.lt.s32.totalorder %s1600_s20, 3  ;;  %p2051_p9 = scmp.ge.s32.totalorder %s1600_s20, 1 }
  0x3c   : > { %s1777_s10 = scalar_lea.hbm %s2022_s0, %s1712_s7  ;;  %s197_s5 = scalar_lea.vmem [#allocation2], %s1709_s6 }
  0x3d   : > { %p1769_p11 = pnand %p2051_p9, %p2050_p8  ;;  %s205_s1 = sshll.u32 %s197_s5, 4  ;;  %s1780_s1 = int_to_ptr.vmem [resolvable:$true] %s205_s1 }
  0x3e   : > { %s1786_s24 = scalar_lea.hbm %s2024_s2, %s1712_s7  ;;  %s2053_s11 = sand.u32 1, %s1588_s17  }
  0x3f   : > { %s2052_s13 = scalar_select %p1769_p11, 1, 0 }
  0x40   : > { %s1790_s23 = scalar_lea.sflag [#allocation3], %s2053_s11  ;;  %s1422_s19 = scalar_lea.hbm %s1777_s10, 512 }
  0x41   : > { %p1423_p12 = scmp.ne.s32.totalorder %s1777_s10, %s1422_s19  ;;  %s1427_s29 = scalar_lea.hbm %s2022_s0, 1024 }
  0x42   : > { %p1428_p6 = scmp.lt.u32.totalorder %s1777_s10, %s2022_s0  ;;  %p1429_p13 = scmp.lt.u32.totalorder %s1427_s29, %s1422_s19 }
  0x43   : > { %p1425_p1 = pnand %p1423_p12, %p1738_p4  ;;  %p1431_p5 = scmp.lt.u32.totalorder %s1422_s19, %s1777_s10 }
  0x44   : > { %p1430_p3 = por %p1429_p13, %p1428_p6 }
  0x45   : > { %p1426_p2 = pneg %p1425_p1 }
  0x46   : > { %p1432_p7 = por %p1431_p5, %p1430_p3 }
  0x48   : > { %p1433_p10 = pnand %p1432_p7, %p1426_p2 }
  0x4a   : > { %1436 = shalt.err (!%p1433_p10)
}
  0x4b   : > { %s1437_s7 = scalar_lea.vmem %s1780_s1, 512  ;;  %s1605_s11 = smov [#allocation2]  }
  0x4c   : > { %p1438_p8 = scmp.ne.s32.totalorder %s1780_s1, %s1437_s7  ;;  %s1442_s12 = sshll.u32 %s1605_s11, 4  ;;  %s1443_s12 = int_to_ptr.vmem [resolvable:$false] %s1442_s12 }
  0x4d   : > { %s1444_s20 = scalar_lea.vmem %s1443_s12, 1024  ;;  %p1445_p1 = scmp.lt.s32.totalorder %s1780_s1, %s1443_s12 }
  0x4e   : > { %p1440_p9 = pnand %p1438_p8, %p1738_p4  ;;  %p1446_p11 = scmp.lt.s32.totalorder %s1444_s20, %s1437_s7 }
  0x50   : > { %p1441_p12 = pneg %p1440_p9  ;;  %p1447_p6 = por %p1446_p11, %p1445_p1 }
  0x52   : > { %p1448_p13 = pnand %p1447_p6, %p1441_p12 }
  0x54   : > { %1451 = shalt.err (!%p1448_p13)
}
  0x55   : > { %s2054_s19 = smov 8   ;;  %s2055_s29 = smov 128  }
  0x56   : > { %1306 = dma.hbm_to_vmem [thread:$0]  (!%p1716_p0), %s1777_s10, 512, %s1780_s1, %s1790_s23, %s2055_s29, %s2055_s29, %s2054_s19  }
  0x57   : > { %s240_s14 = scalar_lea.vmem [#allocation7], %s1709_s6  ;;  %s1452_s26 = scalar_lea.hbm %s1786_s24, 512 }
  0x58   : > { %s247_s9 = sshll.u32 %s240_s14, 4  ;;  %p1453_p11 = scmp.ne.s32.totalorder %s1786_s24, %s1452_s26  ;;  %s1818_s9 = int_to_ptr.vmem [resolvable:$true] %s247_s9 }
  0x59   : > { %s1457_s11 = scalar_lea.hbm %s2024_s2, 1024  ;;  %p1458_p5 = scmp.lt.u32.totalorder %s1786_s24, %s2024_s2 }
  0x5a   : > { %p1455_p2 = pnand %p1453_p11, %p1738_p4  ;;  %p1459_p7 = scmp.lt.u32.totalorder %s1457_s11, %s1452_s26 }
  0x5b   : > { %p1461_p8 = scmp.lt.u32.totalorder %s1452_s26, %s1786_s24 }
  0x5c   : > { %p1456_p3 = pneg %p1455_p2  ;;  %p1460_p10 = por %p1459_p7, %p1458_p5 }
  0x5e   : > { %p1462_p9 = por %p1461_p8, %p1460_p10 }
  0x60   : > { %p1463_p12 = pnand %p1462_p9, %p1456_p3 }
  0x62   : > { %1466 = shalt.err (!%p1463_p12)
}
  0x63   : > { %s1467_s1 = scalar_lea.vmem %s1818_s9, 512  ;;  %s1606_s23 = smov [#allocation7]  }
  0x64   : > { %p1468_p1 = scmp.ne.s32.totalorder %s1818_s9, %s1467_s1  ;;  %s1472_s6 = sshll.u32 %s1606_s23, 4  ;;  %s1473_s6 = int_to_ptr.vmem [resolvable:$false] %s1472_s6 }
  0x65   : > { %s1474_s10 = scalar_lea.vmem %s1473_s6, 1024  ;;  %p1475_p11 = scmp.lt.s32.totalorder %s1818_s9, %s1473_s6 }
  0x66   : > { %p1470_p6 = pnand %p1468_p1, %p1738_p4  ;;  %p1476_p2 = scmp.lt.s32.totalorder %s1474_s10, %s1467_s1 }
  0x68   : > { %p1471_p13 = pneg %p1470_p6  ;;  %p1477_p5 = por %p1476_p2, %p1475_p11 }
  0x6a   : > { %p1478_p7 = pnand %p1477_p5, %p1471_p13 }
  0x6c   : > { %1481 = shalt.err (!%p1478_p7)
}
  0x6d   : > { %1312 = dma.hbm_to_vmem [thread:$0]  (!%p1716_p0), %s1786_s24, 512, %s1818_s9, %s1732_s22, %s2055_s29, %s2055_s29, %s2054_s19  }
  0x6e   : > { %p2056_p4 = scmp.ne.s32.totalorder %s2052_s13, 0 }
  0x6f   : > { %s1848_s25 = sand.u32 (!%p2056_p4), 1, %s1584_s16   ;;  %p2057_p3 = scmp.ne.s32.totalorder (!%p2056_p4), %s2043_s27, 0 }
  0x70   : > { %259 = sbr.rel (%p2056_p4) target bundleno = 891 (0x37b), region = 32  ;;  %s1851_s14 = sshll.u32 (!%p2056_p4), %s1848_s25, 5 }
  0x71   : > { %s262_s8 = scalar_lea.sflag (!%p2056_p4), [#allocation3], %s1848_s25  ;;  %s1855_s26 = scalar_lea.vmem (!%p2056_p4), [#allocation2], %s1851_s14 }
  0x77   : > { %1563 = dma.done.wait (%p2057_p3), %s262_s8, 512  }
  0x78   : > { %1565 = vsyncadd (%p2057_p3), %s262_s8, 4294966784  ;;  %s270_s22 = sand.u32 1, %s1669_s21   ;;  %s274_s13 = scalar_lea.vmem [#allocation5], %s1851_s14 }
  0x79   : > { %s271_s24 = scalar_lea.sflag [#allocation6], %s270_s22 }
  0x7a   : > { %1567 = dma.done.wait (%p2057_p3), %s271_s24, 1024  }
  0x7b   : > { %1569 = vsyncadd (%p2057_p3), %s271_s24, 4294966272  ;;  %v1607_v0 = vmov 0.0   ;;  %vm1608_vm0 = vmmov 0   ;;  %vm340_vm1 = vcmask 261120   ;;  %v332_v1 = vld [vmem:[%s274_s13] sm:$0xff]  ;;  %v333_v2 = vld [vmem:[%s274_s13 + $0x8] sm:$0xff] }
  0x7c   : > { %1253 = vmatprep.subr.mxu0 %v1607_v0  ;;  %1255 = vmatprep.mubr.msk.f32.mxu0 %vm1608_vm0, %v1607_v0  ;;  %v328_v3 = vld [vmem:[%s1855_s26] sm:$0xff]  ;;  %v329_v4 = vld [vmem:[%s1855_s26 + $0x8] sm:$0xff]  ;;  %v334_v5 = vld [vmem:[%s274_s13 + $0x10] sm:$0xff]  ;;  %vm649_vm2 = vcmask 64512   ;;  %s283_s21 = scalar_lea.vmem [#allocation7], %s1851_s14  ;;  %s322_s27 = scalar_lea.vmem [#allocation9], %s1851_s14 }
  0x7d   : > { %1258 = vmatprep.subr.mxu1 %v1607_v0  ;;  %1260 = vmatprep.mubr.msk.f32.mxu1 %vm1608_vm0, %v1607_v0  ;;  %v335_v6 = vld [vmem:[%s274_s13 + $0x18] sm:$0xff]  ;;  %v330_v7 = vld [vmem:[%s1855_s26 + $0x10] sm:$0xff]  ;;  %v336_v45 = vld [vmem:[%s283_s21] sm:$0xff]  ;;  %s1235_s19 = sshll.u32 %s1592_s18, 9  ;;  %s1031_s7 = sshll.u32 %s322_s27, 4  ;;  %s1929_s7 = int_to_ptr.vmem [resolvable:$true] %s1031_s7 }
  0x7e   : > { %1254 = vmatpush3.xpose.msk.msra.mxu0 %vm340_vm1, %v332_v1  ;;  %1259 = vmatpush3.xpose.msk.msra.mxu1 %vm340_vm1, %v333_v2  ;;  %v331_v8 = vld [vmem:[%s1855_s26 + $0x18] sm:$0xff]  ;;  %v337_v46 = vld [vmem:[%s283_s21 + $0x8] sm:$0xff]  ;;  %v338_v53 = vld [vmem:[%s283_s21 + $0x10] sm:$0xff]  ;;  %s1927_s5 = scalar_lea.hbm %s2026_s4, %s1235_s19  ;;  %s1000_s11 = scalar_lea.sflag [#allocation10], %s1848_s25 }
  0x7f   : > { %1263 = vmatprep.subr.mxu0 %v1607_v0  ;;  %1268 = vmatprep.subr.mxu1 %v1607_v0  ;;  %v339_v57 = vld [vmem:[%s283_s21 + $0x18] sm:$0xff]  ;;  %s1482_s12 = scalar_lea.vmem %s1929_s7, 512  ;;  %p2058_p10 = scmp.ne.s32.totalorder %s2044_s28, 0 }
  0x80   : > { %p1483_p0 = scmp.ne.s32.totalorder %s1929_s7, %s1482_s12  ;;  %s1609_s20 = smov [#allocation9]  }
  0x81   : > { %1256 = vmatmul.mubr.msk.f32.vlgmr.msra.gmra.mrb[0].mxu0 %vm340_vm1, %v328_v3  ;;  %1261 = vmatmul.mubr.msk.f32.vlgmr.msra.gmra.mrb[0].mxu1 %vm340_vm1, %v329_v4  ;;  %s1486_s1 = sshll.u32 %s1609_s20, 4  ;;  %s1487_s1 = int_to_ptr.vmem [resolvable:$false] %s1486_s1 }
  0x82   : > { %1264 = vmatpush3.xpose.msk.msra.mxu0 %vm340_vm1, %v334_v5  ;;  %1265 = vmatprep.mubr.msk.f32.mxu0 %vm1608_vm0, %v1607_v0  ;;  %p1484_p8 = pnand %p1483_p0, %p2058_p10  ;;  %s1488_s23 = scalar_lea.vmem %s1487_s1, 1024 }
  0x83   : > { %1269 = vmatpush3.xpose.msk.msra.mxu1 %vm340_vm1, %v335_v6  ;;  %1270 = vmatprep.mubr.msk.f32.mxu1 %vm1608_vm0, %v1607_v0  ;;  %p1489_p12 = scmp.lt.s32.totalorder %s1929_s7, %s1487_s1  ;;  %p1490_p1 = scmp.lt.s32.totalorder %s1488_s23, %s1482_s12 }
  0x84   : > { %1273 = vmatprep.subr.mxu0 %v1607_v0  ;;  %1278 = vmatprep.subr.mxu1 %v1607_v0  ;;  %p1485_p9 = pneg %p1484_p8 }
  0x85   : > { %1266 = vmatmul.mubr.msk.f32.vlgmr.msra.gmra.mrb[2].mxu0 %vm340_vm1, %v330_v7  ;;  %p1491_p6 = por %p1490_p1, %p1489_p12 }
  0x86   : > { %1271 = vmatmul.mubr.msk.f32.vlgmr.msra.gmra.mrb[2].mxu1 %vm340_vm1, %v331_v8  ;;  %1275 = vmatprep.mubr.msk.f32.mxu0 %vm1608_vm0, %v1607_v0 }
  0x87   : > { %1280 = vmatprep.mubr.msk.f32.mxu1 %vm1608_vm0, %v1607_v0  ;;  %1274 = vmatpush3.msra.mxu0 %v336_v45  ;;  %p1492_p13 = pnand %p1491_p6, %p1485_p9 }
  0x88   : > { %1283 = vmatprep.subr.mxu0 %v1607_v0  ;;  %1279 = vmatpush3.msra.mxu1 %v337_v46 }
  0x89   : > { %1288 = vmatprep.subr.mxu1 %v1607_v0 }
 0x154   : > { %v413_v9 = vpop.f32.mrb[0].mxu0  ;;  %v489_v10 = vpop.f32.mrb[0].mxu1 }
 0x155   : > { %v645_v11 = vmul.f32 0.17677669, %v413_v9  ;;  %v1257_v12 = vpop.f32.mrb[1].mxu0  ;;  %v646_v13 = vmul.f32 0.17677669, %v489_v10  ;;  %v1262_v14 = vpop.f32.mrb[1].mxu1 }
 0x157   : > { %v650_v15 = vsel %vm649_vm2, %v645_v11, -inf  ;;  %v653_v20 = vsel %vm649_vm2, %v646_v13, -inf }
 0x158   : > { %651 = vmax.xlane.f32.xlu0 %v650_v15  ;;  %v565_v16 = vpop.f32.mrb[2].mxu0 }
 0x159   : > { %v647_v17 = vmul.f32 0.17677669, %v565_v16  ;;  %v1267_v18 = vpop.f32.mrb[3].mxu0  ;;  %v641_v19 = vpop.f32.mrb[2].mxu1 }
 0x15a   : > { %v648_v21 = vmul.f32 0.17677669, %v641_v19  ;;  %v1272_v22 = vpop.f32.mrb[3].mxu1 }
 0x15b   : > { %v656_v23 = vsel %vm649_vm2, %v647_v17, -inf }
 0x15c   : > { %654 = vmax.xlane.f32.xlu0 %v653_v20  ;;  %657 = vmax.xlane.f32.xlu1 %v656_v23  ;;  %v659_v24 = vsel %vm649_vm2, %v648_v21, -inf }
 0x160   : > { %660 = vmax.xlane.f32.xlu1 %v659_v24 }
 0x1e5   : > { %v652_v25 = vpop.xlane.xlu0 %651 }
 0x1e6   : > { %v662_v26 = vsub.f32 %v645_v11, %v652_v25 }
 0x1e8   : > { %v666_v27 = vmul.f32 1.442695, %v662_v26 }
 0x1e9   : > { %v655_v28 = vpop.xlane.xlu0 %654  ;;  %v658_v29 = vpop.xlane.xlu1 %657 }
 0x1ea   : > { %1376 = vpow2.f32 %v666_v27  ;;  %v663_v30 = vsub.f32 %v646_v13, %v655_v28  ;;  %v664_v31 = vsub.f32 %v647_v17, %v658_v29 }
 0x1ec   : > { %v668_v32 = vmul.f32 1.442695, %v663_v30  ;;  %v670_v33 = vmul.f32 1.442695, %v664_v31 }
 0x1ed   : > { %v661_v34 = vpop.xlane.xlu1 %660 }
 0x1ee   : > { %1378 = vpow2.f32 %v668_v32  ;;  %v665_v35 = vsub.f32 %v648_v21, %v661_v34 }
 0x1ef   : > { %1380 = vpow2.f32 %v670_v33 }
 0x1f0   : > { %v672_v36 = vmul.f32 1.442695, %v665_v35 }
 0x1f2   : > { %1382 = vpow2.f32 %v672_v36 }
 0x1f4   : > { %v1377_v37 = vpop.eup %1376 }
 0x1f5   : > { %v674_v38 = vsel %vm649_vm2, %v1377_v37, 0.0 }
 0x1f6   : > { %675 = vadd.xlane.f32.xlu0 %v674_v38 }
 0x1f8   : > { %v1379_v39 = vpop.eup %1378 }
 0x1f9   : > { %v1381_v40 = vpop.eup %1380  ;;  %v677_v41 = vsel %vm649_vm2, %v1379_v39, 0.0 }
 0x1fa   : > { %678 = vadd.xlane.f32.xlu1 %v677_v41  ;;  %v680_v42 = vsel %vm649_vm2, %v1381_v40, 0.0 }
 0x1fb   : > { %681 = vadd.xlane.f32.xlu0 %v680_v42 }
 0x1fc   : > { %v1383_v43 = vpop.eup %1382 }
 0x1fd   : > { %v683_v44 = vsel %vm649_vm2, %v1383_v43, 0.0 }
 0x1fe   : > { %684 = vadd.xlane.f32.xlu1 %v683_v44 }
 0x283   : > { %v676_v47 = vpop.xlane.xlu0 %675 }
 0x284   : > { %1384 = vrcp.f32 %v676_v47 }
 0x287   : > { %v679_v48 = vpop.xlane.xlu1 %678 }
 0x288   : > { %v682_v49 = vpop.xlane.xlu0 %681  ;;  %1386 = vrcp.f32 %v679_v48 }
 0x289   : > { %1388 = vrcp.f32 %v682_v49 }
 0x28b   : > { %v685_v50 = vpop.xlane.xlu1 %684 }
 0x28c   : > { %1390 = vrcp.f32 %v685_v50 }
 0x28e   : > { %v1385_v51 = vpop.eup %1384 }
 0x28f   : > { %v690_v52 = vmul.f32 %v1385_v51, %v1377_v37 }
 0x291   : > { %990 = vst.msk [vmem:[%s322_s27] sm:$0xff] %vm649_vm2, %v690_v52  ;;  %1276 = vmatmul.mubr.msk.f32.vlgmr.msra.gmra.mrb[4].mxu0 %vm649_vm2, %v690_v52 }
 0x292   : > { %v1387_v54 = vpop.eup %1386  ;;  %1284 = vmatpush3.msra.mxu0 %v338_v53  ;;  %1285 = vmatprep.mubr.msk.f32.mxu0 %vm1608_vm0, %v1607_v0 }
 0x293   : > { %v1389_v55 = vpop.eup %1388  ;;  %v691_v56 = vmul.f32 %v1387_v54, %v1379_v39 }
 0x294   : > { %v692_v58 = vmul.f32 %v1389_v55, %v1381_v40 }
 0x295   : > { %991 = vst.msk [vmem:[%s322_s27 + $0x8] sm:$0xff] %vm649_vm2, %v691_v56  ;;  %1281 = vmatmul.mubr.msk.f32.vlgmr.msra.gmra.mrb[4].mxu1 %vm649_vm2, %v691_v56 }
 0x296   : > { %v1391_v59 = vpop.eup %1390  ;;  %992 = vst.msk [vmem:[%s322_s27 + $0x10] sm:$0xff] %vm649_vm2, %v692_v58  ;;  %1286 = vmatmul.mubr.msk.f32.vlgmr.msra.gmra.mrb[6].mxu0 %vm649_vm2, %v692_v58  ;;  %1289 = vmatpush3.msra.mxu1 %v339_v57 }
 0x297   : > { %v693_v60 = vmul.f32 %v1391_v59, %v1383_v43  ;;  %1290 = vmatprep.mubr.msk.f32.mxu1 %vm1608_vm0, %v1607_v0 }
 0x299   : > { %993 = vst.msk [vmem:[%s322_s27 + $0x18] sm:$0xff] %vm649_vm2, %v693_v60  ;;  %1291 = vmatmul.mubr.msk.f32.vlgmr.msra.gmra.mrb[6].mxu1 %vm649_vm2, %v693_v60 }
 0x29a   : > { %1495 = shalt.err (!%p1492_p13)
}
 0x29b   : > { %s1496_s6 = scalar_lea.hbm %s1927_s5, 512  ;;  %s1500_s26 = scalar_lea.hbm %s2026_s4, 1024 }
 0x29c   : > { %p1497_p11 = scmp.ne.s32.totalorder %s1927_s5, %s1496_s6  ;;  %p1501_p7 = scmp.lt.u32.totalorder %s1927_s5, %s2026_s4 }
 0x29d   : > { %p1502_p4 = scmp.lt.u32.totalorder %s1500_s26, %s1496_s6  ;;  %p1504_p0 = scmp.lt.u32.totalorder %s1496_s6, %s1927_s5 }
 0x29e   : > { %p1498_p2 = pnand %p1497_p11, %p2058_p10 }
 0x29f   : > { %p1503_p3 = por %p1502_p4, %p1501_p7 }
 0x2a0   : > { %p1499_p5 = pneg %p1498_p2 }
 0x2a1   : > { %p1505_p8 = por %p1504_p0, %p1503_p3 }
 0x2a3   : > { %p1506_p9 = pnand %p1505_p8, %p1499_p5 }
 0x2a5   : > { %1509 = shalt.err (!%p1506_p9)
}
 0x2a6   : > { %s1610_s13 = smov 128   ;;  %s1611_s21 = smov 8  }
 0x2a7   : > { %1300 = dma.vmem_to_hbm [thread:$0]  (%p2058_p10), %s1929_s7, 512, %s1927_s5, %s1000_s11, %s1610_s13, %s1610_s13, %s1611_s21  }
 0x2a8   : > { %s315_s27 = scalar_lea.vmem [#allocation8], %s1851_s14  ;;  %s1969_s5 = scalar_lea.hbm %s2025_s3, %s1235_s19 }
 0x2a9   : > { %s1014_s29 = sshll.u32 %s315_s27, 4  ;;  %s995_s7 = scalar_lea.sflag [#allocation4], %s1848_s25  ;;  %s1961_s29 = int_to_ptr.vmem [resolvable:$true] %s1014_s29 }
 0x2aa   : > { %s1510_s11 = scalar_lea.vmem %s1961_s29, 512  ;;  %s1612_s12 = smov [#allocation8]  }
 0x2ab   : > { %p1511_p12 = scmp.ne.s32.totalorder %s1961_s29, %s1510_s11  ;;  %s1514_s20 = sshll.u32 %s1612_s12, 4  ;;  %s1515_s20 = int_to_ptr.vmem [resolvable:$false] %s1514_s20 }
 0x2ac   : > { %s1516_s1 = scalar_lea.vmem %s1515_s20, 1024  ;;  %p1517_p13 = scmp.lt.s32.totalorder %s1961_s29, %s1515_s20 }
 0x2ad   : > { %p1512_p1 = pnand %p1511_p12, %p2058_p10  ;;  %p1518_p11 = scmp.lt.s32.totalorder %s1516_s1, %s1510_s11 }
 0x2af   : > { %p1513_p6 = pneg %p1512_p1  ;;  %p1519_p2 = por %p1518_p11, %p1517_p13 }
 0x2b1   : > { %p1520_p5 = pnand %p1519_p2, %p1513_p6 }
 0x364   : > { %v763_v61 = vpop.f32.mrb[4].mxu0 }
 0x365   : > { %986 = vst.msk [vmem:[%s315_s27] sm:$0xff] %vm340_vm1, %v763_v61  ;;  %v1277_v62 = vpop.f32.mrb[5].mxu0 }
 0x368   : > { %v836_v63 = vpop.f32.mrb[4].mxu1 }
 0x369   : > { %987 = vst.msk [vmem:[%s315_s27 + $0x8] sm:$0xff] %vm340_vm1, %v836_v63  ;;  %v909_v0 = vpop.f32.mrb[6].mxu0  ;;  %v1282_v1 = vpop.f32.mrb[5].mxu1 }
 0x36a   : > { %988 = vst.msk [vmem:[%s315_s27 + $0x10] sm:$0xff] %vm340_vm1, %v909_v0  ;;  %v1287_v2 = vpop.f32.mrb[7].mxu0 }
 0x36c   : > { %v982_v3 = vpop.f32.mrb[6].mxu1 }
 0x36d   : > { %989 = vst.msk [vmem:[%s315_s27 + $0x18] sm:$0xff] %vm340_vm1, %v982_v3  ;;  %v1292_v4 = vpop.f32.mrb[7].mxu1 }
 0x36e   : > { %1523 = shalt.err (!%p1520_p5)
}
 0x36f   : > { %s1524_s18 = scalar_lea.hbm %s1969_s5, 512  ;;  %s1528_s6 = scalar_lea.hbm %s2025_s3, 1024 }
 0x370   : > { %p1525_p7 = scmp.ne.s32.totalorder %s1969_s5, %s1524_s18  ;;  %p1529_p0 = scmp.lt.u32.totalorder %s1969_s5, %s2025_s3 }
 0x371   : > { %p1530_p8 = scmp.lt.u32.totalorder %s1528_s6, %s1524_s18  ;;  %p1532_p12 = scmp.lt.u32.totalorder %s1524_s18, %s1969_s5 }
 0x372   : > { %p1526_p4 = pnand %p1525_p7, %p2058_p10 }
 0x373   : > { %p1531_p9 = por %p1530_p8, %p1529_p0 }
 0x374   : > { %p1527_p3 = pneg %p1526_p4 }
 0x375   : > { %p1533_p1 = por %p1532_p12, %p1531_p9 }
 0x377   : > { %p1534_p6 = pnand %p1533_p1, %p1527_p3 }
 0x379   : > { %1537 = shalt.err (!%p1534_p6)
}
 0x37a   : > { %1299 = dma.vmem_to_hbm [thread:$0]  (%p2058_p10), %s1961_s29, 512, %s1969_s5, %s995_s7, %s1610_s13, %s1610_s13, %s1611_s21  }
 0x37b PF: > { %s2059_s26 = sld [smem:[#allocation16_spill]]  ;;  %s1046_s22 = sand.u32 1, %s1580_s15  }
 0x37c   : > { %p2060_p13 = scmp.ne.s32.totalorder %s2046_s30, 0  ;;  %s1047_s24 = scalar_lea.sflag [#allocation4], %s1046_s22 }
 0x381   : > { %p2061_p11 = scmp.ge.s32.totalorder %s2059_s26, 2 }
 0x383   : > { %p1314_p2 = pnand %p2061_p11, %p2060_p13 }
 0x385   : > { %1571 = dma.done.wait (!%p1314_p2), %s1047_s24, 512  }
 0x386   : > { %1573 = vsyncadd (!%p1314_p2), %s1047_s24, 4294966784  ;;  %s1056_s28 = scalar_lea.sflag [#allocation10], %s1046_s22 }
 0x387   : > { %1575 = dma.done.wait (!%p1314_p2), %s1056_s28, 512  }
 0x388   : > { %1577 = vsyncadd (!%p1314_p2), %s1056_s28, 4294966784  ;;  %s27_s20 = sadd.s32 1, %s2059_s26   ;;  %s2062_s25 = sld [smem:[#allocation18_spill]] }
 0x389   : > { %p24_p5 = scmp.ge.s32.totalorder %s27_s20, 4   ;;  %s2063_s18 = sld [smem:[#allocation15_spill]] }
 0x38a   : > { %s2064_s19 = sld [smem:[#allocation17_spill]]  ;;  %s2065_s15 = smov %s1584_s16 }
 0x38b   : > { %s2066_s16 = smov %s1588_s17  ;;  %26 = sbr.rel (!%p24_p5) target bundleno = 12 (0xc), region = 118 }
 0x38e   : > { %s2067_s17 = smov %s2062_s25 }
 0x392   :  { %1061 = vsyncpa [#allocation3], 1 }
 0x393   :  { %1063 = vsyncpa [#allocation3 + $0x1], 1 }
 0x394   :  { %1064 = vsyncpa [#allocation6], 1 }
 0x395   :  { %1066 = vsyncpa [#allocation6 + $0x1], 1 }
 0x396   :  { %1067 = vsyncpa [#allocation4], 1 }
 0x397   :  { %1069 = vsyncpa [#allocation4 + $0x1], 1 }
 0x398   :  { %1070 = vsyncpa [#allocation10], 1 }
 0x399   :  { %1072 = vsyncpa [#allocation10 + $0x1], 1 }

</bundles_post_ra>
